<compile_context>
chip_gen: v6e
topology: v6e:2x2x1
jax: 0.10.0
libtpu: 0.0.40
codegen_flags: <defaults>
</compile_context>

<pallas_src>
import math

import jax
import jax.numpy as jnp
from jax.experimental import pallas as pl
from jax.experimental.pallas import tpu as pltpu

activation_array = []  # mirrors the PyTorch global side effect

_LANE = 128
_SUBLANE = 16                       # bf16 packs 16 rows / vreg along sublanes
_VMEM_BUDGET = 40 * 1024 * 1024     # conservative: fits v7x 64 MiB physical VMEM
_VMEM_LIMIT = 48 * 1024 * 1024      # scoped VMEM limit handed to Mosaic


def _round_up(x, m):
    return ((x + m - 1) // m) * m


def _pick_tile(dim_pad, unit, max_tile):
    """Largest multiple of `unit` that divides `dim_pad` and is <= max_tile (floor: unit)."""
    q = dim_pad // unit
    best = 1
    for d in range(1, int(math.isqrt(q)) + 1):
        if q % d == 0:
            for c in (d, q // d):
                if c * unit <= max_tile and c > best:
                    best = c
    return best * unit


# ---------------------------------------------------------------------------
# Kernels
# ---------------------------------------------------------------------------

def _linear_fullk_kernel(x_ref, w_ref, b_ref, o_ref):
    # x_ref: (tm, K_pad) activation stripe (input dtype, cast to bf16 for the MXU)
    # w_ref: (K_pad, tn) bf16 weight stripe (already transposed to (in, out))
    # b_ref: (1,  tn)    fp32 bias tile
    # o_ref: (tm, tn)    output tile
    acc = jnp.dot(x_ref[...].astype(jnp.bfloat16), w_ref[...],
                  preferred_element_type=jnp.float32)
    o_ref[...] = (acc + b_ref[...]).astype(o_ref.dtype)


def _linear_ktiled_kernel(x_ref, w_ref, b_ref, o_ref, acc_ref):
    # Fallback for K too large to stream as a single stripe.
    k = pl.program_id(2)

    @pl.when(k == 0)
    def _init():
        acc_ref[...] = jnp.zeros_like(acc_ref)

    acc_ref[...] += jnp.dot(x_ref[...].astype(jnp.bfloat16), w_ref[...],
                            preferred_element_type=jnp.float32)

    @pl.when(k == pl.num_programs(2) - 1)
    def _finish():
        o_ref[...] = (acc_ref[...] + b_ref[...]).astype(o_ref.dtype)


# ---------------------------------------------------------------------------
# Parameter preparation (do once; weights are static)
# ---------------------------------------------------------------------------

def prepare_linear_params(weight, bias=None):
    """One-time transform of the PyTorch-layout parameters:
    weight (out, in) -> padded bf16 (K_pad, N_pad); bias -> padded fp32 (1, N_pad)."""
    N, K = weight.shape
    K_pad = _round_up(K, _LANE)
    N_pad = _round_up(N, _LANE)
    w_p = jnp.pad(weight.T.astype(jnp.bfloat16), ((0, K_pad - K), (0, N_pad - N)))
    b = jnp.zeros((N,), jnp.float32) if bias is None else bias.astype(jnp.float32)
    b_p = jnp.pad(b, (0, N_pad - N)).reshape(1, N_pad)
    return {"w_p": w_p, "b_p": b_p, "N": N, "K": K}


# ---------------------------------------------------------------------------
# Forward
# ---------------------------------------------------------------------------

def linear_apply(x, params, *, tm_max=512, tn_max=512, tk_max=2048,
                 max_vmem_bytes=_VMEM_BUDGET):
    """y = x @ weight.T + bias using pre-prepared params. Preserves leading dims of x.

    Note: the MXU is fed bf16 operands (fp32 accumulation), so results match an fp32
    reference to roughly 1e-2 relative tolerance.
    """
    w_p, b_p, N, K = params["w_p"], params["b_p"], params["N"], params["K"]
    K_pad, N_pad = w_p.shape

    orig_lead = x.shape[:-1]
    assert x.shape[-1] == K, "in_features mismatch"
    M = int(math.prod(orig_lead)) if orig_lead else 1
    if M == 0:  # empty batch: nothing to do
        return jnp.zeros((*orig_lead, N), x.dtype)

    x2 = x.reshape(M, K)
    M_pad = _round_up(M, _SUBLANE)
    x_bytes = x2.dtype.itemsize
    if M_pad != M or K_pad != K:
        x_p = jnp.pad(x2, ((0, M_pad - M), (0, K_pad - K)))
    else:
        x_p = x2

    # Tile sizes: divisors of the padded dims (no pad-to-tile waste), lane/sublane dense.
    tm = _pick_tile(M_pad, _SUBLANE, tm_max)
    tn = _pick_tile(N_pad, _LANE, tn_max)

    # Guarantee >=2 blocks along a parallel axis when possible (v7x has 2 TensorCores).
    if (M_pad // tm) * (N_pad // tn) == 1:
        if N_pad // _LANE >= 2:
            tn = _pick_tile(N_pad, _LANE, max(_LANE, tn // 2))
        elif M_pad // _SUBLANE >= 2:
            tm = _pick_tile(M_pad, _SUBLANE, max(_SUBLANE, tm // 2))

    cost = pl.CostEstimate(
        flops=2 * M_pad * N_pad * K_pad,
        bytes_accessed=x_bytes * M_pad * K_pad + 2 * K_pad * N_pad
        + x_bytes * M_pad * N_pad,
        transcendentals=0,
    )

    # Full-K fast path: one dot per (i, j), no accumulator round-trip through VMEM.
    fullk_vmem = 2 * (tm * K_pad * x_bytes + K_pad * tn * 2 + tm * tn * x_bytes)
    if fullk_vmem <= max_vmem_bytes:
        grid = (M_pad // tm, N_pad // tn)
        out_p = pl.pallas_call(
            _linear_fullk_kernel,
            out_shape=jax.ShapeDtypeStruct((M_pad, N_pad), x.dtype),
            grid_spec=pltpu.PrefetchScalarGridSpec(
                num_scalar_prefetch=0,
                grid=grid,
                in_specs=[
                    pl.BlockSpec((tm, K_pad), lambda i, j: (i, 0)),
                    pl.BlockSpec((K_pad, tn), lambda i, j: (0, j)),
                    pl.BlockSpec((1, tn), lambda i, j: (0, j)),
                ],
                out_specs=pl.BlockSpec((tm, tn), lambda i, j: (i, j)),
            ),
            compiler_params=pltpu.CompilerParams(
                dimension_semantics=("parallel", "parallel"),
                vmem_limit_bytes=_VMEM_LIMIT),
            cost_estimate=cost,
        )(x_p, w_p, b_p)
    else:
        # K-tiled fallback with an fp32 VMEM accumulator persisting across the K axis.
        tk = _pick_tile(K_pad, _LANE, tk_max)
        while tk > _LANE and (2 * (tm * tk * x_bytes + tk * tn * 2 + tm * tn * x_bytes)
                              + tm * tn * 4) > max_vmem_bytes:
            tk = _pick_tile(K_pad, _LANE, tk // 2)
        grid = (M_pad // tm, N_pad // tn, K_pad // tk)
        out_p = pl.pallas_call(
            _linear_ktiled_kernel,
            out_shape=jax.ShapeDtypeStruct((M_pad, N_pad), x.dtype),
            grid_spec=pltpu.PrefetchScalarGridSpec(
                num_scalar_prefetch=0,
                grid=grid,
                in_specs=[
                    pl.BlockSpec((tm, tk), lambda i, j, k: (i, k)),
                    pl.BlockSpec((tk, tn), lambda i, j, k: (k, j)),
                    pl.BlockSpec((1, tn), lambda i, j, k: (0, j)),
                ],
                out_specs=pl.BlockSpec((tm, tn), lambda i, j, k: (i, j)),
                scratch_shapes=[pltpu.VMEM((tm, tn), jnp.float32)],
            ),
            compiler_params=pltpu.CompilerParams(
                dimension_semantics=("parallel", "parallel", "arbitrary"),
                vmem_limit_bytes=_VMEM_LIMIT),
            cost_estimate=cost,
        )(x_p, w_p, b_p)

    out = out_p[:M, :N].reshape(*orig_lead, N)

    # PyTorch side effect: activation_array.append(mean(|y|)).
    # Kept as an asynchronous device scalar (no float() -> no blocking host sync).
    stat = jnp.mean(jnp.abs(out))
    try:
        is_tracer = isinstance(stat, jax.core.Tracer)
    except Exception:
        is_tracer = True
    if not is_tracer:
        activation_array.append(stat)
    # TODO(synk): under jit/scan the host-list append has no clean Pallas equivalent
    # (would need io_callback); the stat is skipped when traced.

    return out


def linear_pallas(x, weight, bias=None, **kwargs):
    """Convenience wrapper matching the PyTorch forward signature (re-prepares params)."""
    return linear_apply(x, prepare_linear_params(weight, bias), **kwargs)


def init_params(key, in_features, out_features):
    """kaiming_uniform_(a=sqrt(5)) weight + uniform(-1/sqrt(fan_in), ...) bias,
    matching the PyTorch module's reset_parameters()."""
    kw_key, kb_key = jax.random.split(key)
    bound = 1.0 / math.sqrt(in_features)
    weight = jax.random.uniform(
        kw_key, (out_features, in_features),
        minval=-bound, maxval=bound, dtype=jnp.float32)
    bias = jax.random.uniform(
        kb_key, (out_features,), minval=-bound, maxval=bound, dtype=jnp.float32)
    return weight, bias


if __name__ == "__main__":
    key = jax.random.PRNGKey(0)
    kx1, kp1, kx2, kp2 = jax.random.split(key, 4)

    TOL = dict(atol=5e-2, rtol=5e-2)  # bf16 MXU operands vs fp32 reference

    # Small shapes implied by the Linear forward: (batch, seq, in_features).
    B, S, IN, OUT = 2, 8, 32, 64
    x = jax.random.normal(kx1, (B, S, IN), dtype=jnp.float32)
    weight, bias = init_params(kp1, IN, OUT)

    params = prepare_linear_params(weight, bias)      # one-time weight prep (cached)
    out = jax.block_until_ready(linear_apply(x, params))
    ref = jnp.einsum("bsk,nk->bsn", x, weight) + bias[None, None, :]
    assert out.shape == (B, S, OUT)
    assert jnp.allclose(out, ref, **TOL)

    # Second shape exercising non-multiple N (pad to 128, no pad-to-tile waste) and the
    # >=2-blocks-per-grid guard for megacore.
    B2, S2, IN2, OUT2 = 2, 48, 768, 200
    x2 = jax.random.normal(kx2, (B2, S2, IN2), dtype=jnp.float32)
    w2, b2 = init_params(kp2, IN2, OUT2)
    params2 = prepare_linear_params(w2, b2)
    out2 = jax.block_until_ready(linear_apply(x2, params2))
    ref2 = jnp.einsum("bsk,nk->bsn", x2, w2) + b2[None, None, :]
    assert out2.shape == (B2, S2, OUT2)
    assert jnp.allclose(out2, ref2, **TOL)

    # Force the K-tiled fallback path (tiny VMEM budget) and check it agrees too.
    out3 = jax.block_until_ready(
        linear_apply(x2, params2, max_vmem_bytes=512 * 1024))
    assert jnp.allclose(out3, ref2, **TOL)

    assert len(activation_array) == 3  # side effect recorded per forward call

    print("KERNEL_OK")
</pallas_src>

<mosaic_0001>
module attributes {stable_mosaic.version = 11 : i64} {
  func.func @_linear_fullk_kernel(%arg0: i32, %arg1: i32, %arg2: memref<16x128xf32, #tpu.memory_space<vmem>>, %arg3: memref<128x128xbf16, #tpu.memory_space<vmem>>, %arg4: memref<1x128xf32, #tpu.memory_space<vmem>>, %arg5: memref<16x128xf32, #tpu.memory_space<vmem>>) attributes {dimension_semantics = [#tpu.dimension_semantics<parallel>, #tpu.dimension_semantics<parallel>], iteration_bounds = array<i64: 1, 1>, scalar_prefetch = 0 : i64, scratch_operands = 0 : i64, tpu.core_type = #tpu.core_type<tc>, window_params = [{transform_indices = @transform_0, window_bounds = array<i64: 16, 128>}, {transform_indices = @transform_1, window_bounds = array<i64: 128, 128>}, {transform_indices = @transform_2, window_bounds = array<i64: 1, 128>}, {transform_indices = @transform_3, window_bounds = array<i64: 16, 128>}]} {
    %c0 = arith.constant 0 : index
    %c0_0 = arith.constant 0 : index
    %0 = vector.load %arg2[%c0, %c0_0] : memref<16x128xf32, #tpu.memory_space<vmem>>, vector<16x128xf32>
    %1 = arith.truncf %0 : vector<16x128xf32> to vector<16x128xbf16>
    %c0_1 = arith.constant 0 : index
    %c0_2 = arith.constant 0 : index
    %2 = vector.load %arg3[%c0_1, %c0_2] : memref<128x128xbf16, #tpu.memory_space<vmem>>, vector<128x128xbf16>
    %cst = arith.constant dense<0.000000e+00> : vector<16x128xf32>
    %3 = tpu.matmul %1, %2, %cst {dimension_numbers = #tpu.dot_dimension_numbers<[1], [0], [0], [1], [0, 0, 1, 1], [], []>} : vector<16x128xbf16>, vector<128x128xbf16>, vector<16x128xf32> -> vector<16x128xf32>
    %c0_3 = arith.constant 0 : index
    %c0_4 = arith.constant 0 : index
    %4 = vector.load %arg4[%c0_3, %c0_4] : memref<1x128xf32, #tpu.memory_space<vmem>>, vector<1x128xf32>
    %5 = vector.broadcast %4 : vector<1x128xf32> to vector<16x128xf32>
    %6 = arith.addf %3, %5 : vector<16x128xf32>
    %c0_5 = arith.constant 0 : index
    %c0_6 = arith.constant 0 : index
    %7 = vector.load %arg5[%c0_5, %c0_6] : memref<16x128xf32, #tpu.memory_space<vmem>>, vector<16x128xf32>
    tpu.vector_store %arg5[%c0_5, %c0_6], %6 {strides = array<i32>} : memref<16x128xf32, #tpu.memory_space<vmem>>, vector<16x128xf32>,
    return
  }
  func.func @transform_0(%arg0: i32, %arg1: i32) -> (i32, i32) {
    %c0_i32 = arith.constant 0 : i32
    %c0_i32_0 = arith.constant 0 : i32
    return %arg0, %c0_i32 : i32, i32
  }
  func.func @transform_1(%arg0: i32, %arg1: i32) -> (i32, i32) {
    %c0_i32 = arith.constant 0 : i32
    %c0_i32_0 = arith.constant 0 : i32
    return %c0_i32, %arg1 : i32, i32
  }
  func.func @transform_2(%arg0: i32, %arg1: i32) -> (i32, i32) {
    %c0_i32 = arith.constant 0 : i32
    %c0_i32_0 = arith.constant 0 : i32
    return %c0_i32, %arg1 : i32, i32
  }
  func.func @transform_3(%arg0: i32, %arg1: i32) -> (i32, i32) {
    %c0_i32 = arith.constant 0 : i32
    return %arg0, %arg1 : i32, i32
  }
}

</mosaic_0001>

<bundles_post_ra>
// kernel: tpu_custom_call.1
= control target key start
LH: loop header
LB: loop body
LE: loop exit
PB: predicated region body
PF: predicated region fallthrough
CT: control target
= control target key end

     0   :  { %8 = vsyncpa [#allocation3], 0  ;;  %s347_s0 = inlined_call_operand.hbm [shape: f32[16,128], index: 0, kind: input, shape index: {}]   ;;  %s348_s1 = inlined_call_operand.hbm [shape: bf16[128,128], index: 1, kind: input, shape index: {}]   ;;  %s349_s2 = inlined_call_operand.vmem [shape: f32[1,128], index: 2, kind: input, shape index: {}]   ;;  %s350_s3 = inlined_call_operand.hbm [shape: f32[16,128], index: 3, kind: output, shape index: {}]  }
   0x1   :  { %9 = vsyncpa [#allocation6], 0 }
   0x2   :  { %10 = vsyncpa [#allocation4], 0  ;;  %s300_s12 = smov [#allocation2]  }
   0x3   :  { %s16_s13 = sshll.u32 %s300_s12, 4  ;;  %s17_s13 = int_to_ptr.vmem [resolvable:$true] %s16_s13 }
   0x4   :  { %s242_s14 = scalar_lea.vmem %s17_s13, 256  ;;  %p247_p1 = scmp.lt.s32.totalorder %s17_s13, %s17_s13 }
   0x5   :  { %p243_p0 = scmp.ne.s32.totalorder %s17_s13, %s242_s14  ;;  %p248_p2 = scmp.lt.s32.totalorder %s242_s14, %s242_s14 }
   0x7   :  { %p249_p3 = por %p248_p2, %p247_p1 }
   0x9   :  { %p250_p4 = pnand %p249_p3, %p243_p0 }
   0xb   :  { %253 = shalt.err (!%p250_p4)
}
   0xc   :  { %s301_s15 = smov 128   ;;  %s302_s16 = smov 8  }
   0xd   :  { %22 = dma.hbm_to_vmem [thread:$0]  %s347_s0, 256, %s17_s13, [#allocation3], %s301_s15, %s301_s15, %s302_s16  }
   0xe   :  { %s303_s19 = smov [#allocation5]  }
   0xf   :  { %s28_s20 = sshll.u32 %s303_s19, 4  ;;  %s29_s20 = int_to_ptr.vmem [resolvable:$true] %s28_s20 }
  0x10   :  { %s262_s21 = scalar_lea.vmem %s29_s20, 1024  ;;  %p267_p6 = scmp.lt.s32.totalorder %s29_s20, %s29_s20 }
  0x11   :  { %p263_p5 = scmp.ne.s32.totalorder %s29_s20, %s262_s21  ;;  %p268_p7 = scmp.lt.s32.totalorder %s262_s21, %s262_s21 }
  0x13   :  { %p269_p8 = por %p268_p7, %p267_p6 }
  0x15   :  { %p270_p9 = pnand %p269_p8, %p263_p5 }
  0x17   :  { %273 = shalt.err (!%p270_p9)
}
  0x18   :  { %s304_s22 = smov 64   ;;  %s305_s23 = smov 4  }
  0x19   :  { %34 = dma.hbm_to_vmem [thread:$0]  %s348_s1, 1024, %s29_s20, [#allocation6], %s304_s22, %s304_s22, %s305_s23  }
  0x1a   :  { %294 = dma.done.wait [#allocation3], 256  }
  0x1b   :  { %295 = vsyncadd [#allocation3], 4294967040 }
  0x1c   :  { %296 = dma.done.wait [#allocation6], 1024  }
  0x1d   :  { %297 = vsyncadd [#allocation6], 4294966272  ;;  %v306_v0 = vmov 0.0   ;;  %vm307_vm0 = vmmov 0   ;;  %v226_v1 = vld [vmem:[#allocation5 + $0x38] sm:$0xff]   ;;  %v227_v2 = vld [vmem:[#allocation5 + $0x30] sm:$0xff]  }
  0x1e   :  { %197 = vmatprep.subr.bf16.mxu0 %v306_v0  ;;  %213 = vmatprep.mubr.msk.bf16.mxu0 %vm307_vm0, %v306_v0  ;;  %v228_v3 = vld [vmem:[#allocation5 + $0x28] sm:$0xff]   ;;  %v229_v4 = vld [vmem:[#allocation5 + $0x20] sm:$0xff]   ;;  %v230_v5 = vld [vmem:[#allocation5 + $0x18] sm:$0xff]   ;;  %s308_s26 = smov [#allocation7]  }
  0x1f   :  { %198 = vmatpush3.bf16.msra.mxu0 %v226_v1  ;;  %v231_v6 = vld [vmem:[#allocation5 + $0x10] sm:$0xff]   ;;  %v232_v7 = vld [vmem:[#allocation5 + $0x8] sm:$0xff]   ;;  %v233_v8 = vld [vmem:[#allocation5] sm:$0xff]   ;;  %s166_s27 = sshll.u32 %s308_s26, 4  ;;  %s167_s27 = int_to_ptr.vmem [resolvable:$true] %s166_s27 }
  0x20   :  { %199 = vmatprep.subr.bf16.mxu0 %v306_v0  ;;  %v44_v9 = vld [vmem:[#allocation2] sm:$0xff]  ;;  %v45_v10 = vld [vmem:[#allocation2 + $0x8] sm:$0xff]  ;;  %s274_s28 = scalar_lea.vmem %s167_s27, 256  ;;  %p279_p11 = scmp.lt.s32.totalorder %s167_s27, %s167_s27 }
  0x21   :  { %v46_v11 = vpack.c.bf16 %v45_v10, %v44_v9  ;;  %v179_v12 = vld [vmem:[%s349_s2] ss:$0 sm:$0xff]  ;;  %p275_p10 = scmp.ne.s32.totalorder %s167_s27, %s274_s28  ;;  %p280_p12 = scmp.lt.s32.totalorder %s274_s28, %s274_s28 }
  0x23   :  { %200 = vmatpush3.bf16.msra.mxu0 %v227_v2  ;;  %p281_p13 = por %p280_p12, %p279_p11 }
  0x24   :  { %201 = vmatprep.subr.bf16.mxu0 %v306_v0 }
  0x25   :  { %p282_p0 = pnand %p281_p13, %p275_p10 }
  0x27   :  { %202 = vmatpush3.bf16.msra.mxu0 %v228_v3 }
  0x28   :  { %203 = vmatprep.subr.bf16.mxu0 %v306_v0 }
  0x2b   :  { %204 = vmatpush3.bf16.msra.mxu0 %v229_v4 }
  0x2c   :  { %205 = vmatprep.subr.bf16.mxu0 %v306_v0 }
  0x2f   :  { %206 = vmatpush3.bf16.msra.mxu0 %v230_v5 }
  0x30   :  { %207 = vmatprep.subr.bf16.mxu0 %v306_v0 }
  0x33   :  { %208 = vmatpush3.bf16.msra.mxu0 %v231_v6 }
  0x34   :  { %209 = vmatprep.subr.bf16.mxu0 %v306_v0 }
  0x37   :  { %210 = vmatpush3.bf16.msra.mxu0 %v232_v7 }
  0x38   :  { %211 = vmatprep.subr.bf16.mxu0 %v306_v0 }
  0x3b   :  { %212 = vmatpush3.bf16.msra.mxu0 %v233_v8 }
  0x3e   :  { %214 = vmatmul.mubr.bf16.vlgmr.msra.gmra.mxu0 %v46_v11 }
  0xfe   :  { %v152_v13 = vpop.f32.mrf.mxu0 }
  0xff   :  { %v153_v14 = vadd.f32 %v179_v12, %v152_v13 }
 0x100   :  { %v215_v15 = vpop.f32.mrf.mxu0 }
 0x101   :  { %159 = vst [vmem:[#allocation7] sm:$0xff] %v153_v14 }
 0x102   :  { %v155_v16 = vpop.f32.mrf.mxu0 }
 0x103   :  { %v156_v17 = vadd.f32 %v179_v12, %v155_v16 }
 0x104   :  { %v216_v18 = vpop.f32.mrf.mxu0 }
 0x105   :  { %160 = vst [vmem:[#allocation7 + $0x8] sm:$0xff] %v156_v17 }
 0x106   :  { %285 = shalt.err (!%p282_p0)
}
 0x107   :  { %172 = dma.vmem_to_hbm [thread:$0]  %s167_s27, 256, %s350_s3, [#allocation4], %s301_s15, %s301_s15, %s302_s16  }
 0x108   :  { %298 = dma.done.wait [#allocation4], 256  }
 0x109   :  { %299 = vsyncadd [#allocation4], 4294967040 }
 0x10a   :  { %176 = vsyncpa [#allocation3], 1 }
 0x10b   :  { %177 = vsyncpa [#allocation6], 1 }
 0x10c   :  { %178 = vsyncpa [#allocation4], 1 }

</bundles_post_ra>
